<compile_context>
chip_gen: v5e
topology: v5e:2x2
jax: 0.10.0
libtpu: 0.0.40
codegen_flags: <defaults>
</compile_context>

<pallas_src>
import functools

import jax
import jax.numpy as jnp
import numpy as np
from jax.experimental import pallas as pl
from jax.experimental.pallas import tpu as pltpu


def _round_up(x, m):
    return ((x + m - 1) // m) * m


def _cnn_kernel(x_ref, w_ref, b_ref, o_ref, *, e_char, kernel_size, out_len,
                fuse_time):
    """One grid step: a (B_TILE, e_chunk) output tile.

    x_ref: (B_TILE, m_word * e_char)  chars, channel-minor, compute dtype
    w_ref: (K * e_char, e_chunk)      fused-tap conv weights, compute dtype
    b_ref: (1, e_chunk)               conv bias, f32
    o_ref: (B_TILE, e_chunk)          max-over-time pooled features
    """
    ck = kernel_size * e_char
    b_tile, e_chunk = o_ref.shape

    xt = x_ref[...]      # load the tile once; slice the value, not the ref
    w = w_ref[...]       # weights stay resident across the time loop
    bias = b_ref[...]    # (1, e_chunk) f32, broadcast over the batch tile

    if fuse_time:
        # Fuse time into the M dimension of a single MXU dot: im2col LHS of
        # shape (out_len * B_TILE, ck) built from static lane-shifted views.
        wins = [xt[:, t * e_char:t * e_char + ck] for t in range(out_len)]
        lhs = jnp.concatenate(wins, axis=0)                      # (T*B, ck)
        z = jnp.dot(lhs, w, preferred_element_type=jnp.float32)  # (T*B, E)
        # Max over time: sublane-aligned static slices (b_tile is a multiple
        # of the sublane packing), pure VPU maximums.
        pooled = z[0:b_tile]
        for t in range(1, out_len):
            pooled = jnp.maximum(pooled, z[t * b_tile:(t + 1) * b_tile])
    else:
        # Per-time-step dots (realistic ck): contraction depth is already
        # near MXU-native, so keep z's live range short.
        pooled = jnp.full((b_tile, e_chunk), -jnp.inf, jnp.float32)
        for t in range(out_len):                 # static, unrolled at trace
            win = xt[:, t * e_char:t * e_char + ck]              # (B, ck)
            z = jnp.dot(win, w, preferred_element_type=jnp.float32)
            pooled = jnp.maximum(pooled, z)

    # Bias + ReLU applied once (hoisted out of the time loop); lane-dense store.
    o_ref[...] = jnp.maximum(pooled + bias, 0.0).astype(o_ref.dtype)


def cnn_forward(x, w, b, *, b_tile=512, compute_dtype=jnp.bfloat16):
    """x: (B, e_char, m_word); w: (e_word, e_char, K); b: (e_word,).

    Returns (B, e_word) = max_t relu(conv1d(x))  (matches the PyTorch module).
    """
    B, e_char, m_word = x.shape
    e_word, e_char_w, K = w.shape
    assert e_char_w == e_char
    out_len = m_word - K + 1
    assert out_len >= 1, "m_word must be >= kernel_size"
    ck = K * e_char

    # --- wrapper-side layout plumbing (no data duplication) ---
    # x2[b, t*e_char + c] = x[b, c, t]  (channel-minor flattening)
    x2 = jnp.transpose(x, (0, 2, 1)).reshape(B, m_word * e_char)
    # w_col[k*e_char + c, o] = w[o, c, k]  (fused-tap weight matrix)
    w_col = jnp.transpose(w, (2, 1, 0)).reshape(ck, e_word)
    b2 = b.reshape(1, e_word).astype(jnp.float32)

    # Lane-pad e_word to a multiple of 128 so output stores are unmasked.
    e_word_p = _round_up(e_word, 128)
    if e_word_p != e_word:
        w_col = jnp.pad(w_col, ((0, 0), (0, e_word_p - e_word)))
        b2 = jnp.pad(b2, ((0, 0), (0, e_word_p - e_word)))
    # e_word chunking keeps accumulator live state <= ~16 vregs (no spills).
    e_chunk = 256 if (e_word_p % 256 == 0 and e_word_p >= 256) else 128

    # Batch tiling.  Row multiple: 16 for bf16 sublane packing, 8 for f32.
    row_mult = 16 if compute_dtype == jnp.bfloat16 else 8
    if B > row_mult:
        # Cap the tile so the batch axis has >= 2 grid steps (v7x: 2 TCs).
        max_tile = _round_up(pl.cdiv(B, 2), row_mult)
    else:
        max_tile = _round_up(B, row_mult)
    b_tile = _round_up(min(b_tile, max_tile), row_mult)
    b_pad = _round_up(B, b_tile)
    if b_pad != B:
        x2 = jnp.pad(x2, ((0, b_pad - B), (0, 0)))

    x2 = x2.astype(compute_dtype)
    w_col = w_col.astype(compute_dtype)

    # Fuse time into one big dot only when the per-t contraction is tiny
    # (toy char-CNN shapes); realistic ck is already near MXU-native depth.
    fuse_time = ck <= 64

    kernel = functools.partial(
        _cnn_kernel, e_char=e_char, kernel_size=K, out_len=out_len,
        fuse_time=fuse_time,
    )

    out = pl.pallas_call(
        kernel,
        out_shape=jax.ShapeDtypeStruct((b_pad, e_word_p), x.dtype),
        grid=(b_pad // b_tile, e_word_p // e_chunk),
        in_specs=[
            pl.BlockSpec((b_tile, m_word * e_char), lambda i, j: (i, 0)),
            pl.BlockSpec((ck, e_chunk), lambda i, j: (0, j)),
            pl.BlockSpec((1, e_chunk), lambda i, j: (0, j)),
        ],
        out_specs=pl.BlockSpec((b_tile, e_chunk), lambda i, j: (i, j)),
        compiler_params=pltpu.CompilerParams(
            dimension_semantics=("parallel", "parallel"),
        ),
    )(x2, w_col, b2)
    return out[:B, :e_word]


def cnn_reference(x, w, b):
    """Pure-JAX f32 reference mirroring the PyTorch forward."""
    B, C, M = x.shape
    E, _, K = w.shape
    L = M - K + 1
    windows = jnp.stack([x[:, :, k:k + L] for k in range(K)], axis=-1)  # (B,C,L,K)
    conv = jnp.einsum("ock,bctk->bot", w, windows) + b[None, :, None]
    return jnp.max(jax.nn.relu(conv), axis=2)


if __name__ == "__main__":
    # Small shapes implied by the module: x is (batch, e_char, m_word).
    batch, e_char, m_word = 2, 4, 16
    e_word, kernel_size = 32, 5

    key = jax.random.PRNGKey(0)
    kx, kw, kb = jax.random.split(key, 3)

    x = jax.random.normal(kx, (batch, e_char, m_word), dtype=jnp.float32)
    fan_in = e_char * kernel_size
    bound = 1.0 / np.sqrt(fan_in)
    w = jax.random.uniform(kw, (e_word, e_char, kernel_size),
                           minval=-bound, maxval=bound, dtype=jnp.float32)
    b = jax.random.uniform(kb, (e_word,), minval=-bound, maxval=bound,
                           dtype=jnp.float32)

    ref = cnn_reference(x, w, b)

    # Exact-semantics f32 path (parity with the PyTorch module).
    out_f32 = jax.block_until_ready(
        cnn_forward(x, w, b, compute_dtype=jnp.float32))
    np.testing.assert_allclose(np.asarray(out_f32), np.asarray(ref),
                               rtol=1e-5, atol=1e-5)

    # Default bf16-matmul / f32-accumulate path (perf config).
    out_bf16 = jax.block_until_ready(cnn_forward(x, w, b))
    np.testing.assert_allclose(np.asarray(out_bf16), np.asarray(ref),
                               rtol=2e-2, atol=3e-2)

    print("KERNEL_OK")
</pallas_src>

<mosaic_0001>
module attributes {stable_mosaic.version = 11 : i64} {
  func.func @_cnn_kernel(%arg0: i32, %arg1: i32, %arg2: memref<8x64xf32, #tpu.memory_space<vmem>>, %arg3: memref<20x128xf32, #tpu.memory_space<vmem>>, %arg4: memref<1x128xf32, #tpu.memory_space<vmem>>, %arg5: memref<8x128xf32, #tpu.memory_space<vmem>>) attributes {dimension_semantics = [#tpu.dimension_semantics<parallel>, #tpu.dimension_semantics<parallel>], iteration_bounds = array<i64: 1, 1>, scalar_prefetch = 0 : i64, scratch_operands = 0 : i64, tpu.core_type = #tpu.core_type<tc>, window_params = [{transform_indices = @transform_0, window_bounds = array<i64: 8, 64>}, {transform_indices = @transform_1, window_bounds = array<i64: 20, 128>}, {transform_indices = @transform_2, window_bounds = array<i64: 1, 128>}, {transform_indices = @transform_3, window_bounds = array<i64: 8, 128>}]} {
    %c0 = arith.constant 0 : index
    %c0_0 = arith.constant 0 : index
    %0 = vector.load %arg2[%c0, %c0_0] : memref<8x64xf32, #tpu.memory_space<vmem>>, vector<8x64xf32>
    %c0_1 = arith.constant 0 : index
    %c0_2 = arith.constant 0 : index
    %1 = vector.load %arg3[%c0_1, %c0_2] : memref<20x128xf32, #tpu.memory_space<vmem>>, vector<20x128xf32>
    %c0_3 = arith.constant 0 : index
    %c0_4 = arith.constant 0 : index
    %2 = vector.load %arg4[%c0_3, %c0_4] : memref<1x128xf32, #tpu.memory_space<vmem>>, vector<1x128xf32>
    %3 = vector.extract_strided_slice %0 {offsets = [0, 0], sizes = [8, 20], strides = [1, 1]} : vector<8x64xf32> to vector<8x20xf32>
    %4 = vector.extract_strided_slice %0 {offsets = [0, 4], sizes = [8, 20], strides = [1, 1]} : vector<8x64xf32> to vector<8x20xf32>
    %5 = vector.extract_strided_slice %0 {offsets = [0, 8], sizes = [8, 20], strides = [1, 1]} : vector<8x64xf32> to vector<8x20xf32>
    %6 = vector.extract_strided_slice %0 {offsets = [0, 12], sizes = [8, 20], strides = [1, 1]} : vector<8x64xf32> to vector<8x20xf32>
    %7 = vector.extract_strided_slice %0 {offsets = [0, 16], sizes = [8, 20], strides = [1, 1]} : vector<8x64xf32> to vector<8x20xf32>
    %8 = vector.extract_strided_slice %0 {offsets = [0, 20], sizes = [8, 20], strides = [1, 1]} : vector<8x64xf32> to vector<8x20xf32>
    %9 = vector.extract_strided_slice %0 {offsets = [0, 24], sizes = [8, 20], strides = [1, 1]} : vector<8x64xf32> to vector<8x20xf32>
    %10 = vector.extract_strided_slice %0 {offsets = [0, 28], sizes = [8, 20], strides = [1, 1]} : vector<8x64xf32> to vector<8x20xf32>
    %11 = vector.extract_strided_slice %0 {offsets = [0, 32], sizes = [8, 20], strides = [1, 1]} : vector<8x64xf32> to vector<8x20xf32>
    %12 = vector.extract_strided_slice %0 {offsets = [0, 36], sizes = [8, 20], strides = [1, 1]} : vector<8x64xf32> to vector<8x20xf32>
    %13 = vector.extract_strided_slice %0 {offsets = [0, 40], sizes = [8, 20], strides = [1, 1]} : vector<8x64xf32> to vector<8x20xf32>
    %14 = vector.extract_strided_slice %0 {offsets = [0, 44], sizes = [8, 20], strides = [1, 1]} : vector<8x64xf32> to vector<8x20xf32>
    %15 = tpu.concatenate %3, %4, %5, %6, %7, %8, %9, %10, %11, %12, %13, %14 in 0 : vector<8x20xf32>, vector<8x20xf32>, vector<8x20xf32>, vector<8x20xf32>, vector<8x20xf32>, vector<8x20xf32>, vector<8x20xf32>, vector<8x20xf32>, vector<8x20xf32>, vector<8x20xf32>, vector<8x20xf32>, vector<8x20xf32> -> vector<96x20xf32>
    %cst = arith.constant dense<0.000000e+00> : vector<96x128xf32>
    %16 = tpu.matmul %15, %1, %cst {dimension_numbers = #tpu.dot_dimension_numbers<[1], [0], [0], [1], [0, 0, 1, 1], [], []>} : vector<96x20xf32>, vector<20x128xf32>, vector<96x128xf32> -> vector<96x128xf32>
    %17 = vector.extract_strided_slice %16 {offsets = [0, 0], sizes = [8, 128], strides = [1, 1]} : vector<96x128xf32> to vector<8x128xf32>
    %18 = vector.extract_strided_slice %16 {offsets = [8, 0], sizes = [8, 128], strides = [1, 1]} : vector<96x128xf32> to vector<8x128xf32>
    %19 = arith.maximumf %17, %18 : vector<8x128xf32>
    %20 = vector.extract_strided_slice %16 {offsets = [16, 0], sizes = [8, 128], strides = [1, 1]} : vector<96x128xf32> to vector<8x128xf32>
    %21 = arith.maximumf %19, %20 : vector<8x128xf32>
    %22 = vector.extract_strided_slice %16 {offsets = [24, 0], sizes = [8, 128], strides = [1, 1]} : vector<96x128xf32> to vector<8x128xf32>
    %23 = arith.maximumf %21, %22 : vector<8x128xf32>
    %24 = vector.extract_strided_slice %16 {offsets = [32, 0], sizes = [8, 128], strides = [1, 1]} : vector<96x128xf32> to vector<8x128xf32>
    %25 = arith.maximumf %23, %24 : vector<8x128xf32>
    %26 = vector.extract_strided_slice %16 {offsets = [40, 0], sizes = [8, 128], strides = [1, 1]} : vector<96x128xf32> to vector<8x128xf32>
    %27 = arith.maximumf %25, %26 : vector<8x128xf32>
    %28 = vector.extract_strided_slice %16 {offsets = [48, 0], sizes = [8, 128], strides = [1, 1]} : vector<96x128xf32> to vector<8x128xf32>
    %29 = arith.maximumf %27, %28 : vector<8x128xf32>
    %30 = vector.extract_strided_slice %16 {offsets = [56, 0], sizes = [8, 128], strides = [1, 1]} : vector<96x128xf32> to vector<8x128xf32>
    %31 = arith.maximumf %29, %30 : vector<8x128xf32>
    %32 = vector.extract_strided_slice %16 {offsets = [64, 0], sizes = [8, 128], strides = [1, 1]} : vector<96x128xf32> to vector<8x128xf32>
    %33 = arith.maximumf %31, %32 : vector<8x128xf32>
    %34 = vector.extract_strided_slice %16 {offsets = [72, 0], sizes = [8, 128], strides = [1, 1]} : vector<96x128xf32> to vector<8x128xf32>
    %35 = arith.maximumf %33, %34 : vector<8x128xf32>
    %36 = vector.extract_strided_slice %16 {offsets = [80, 0], sizes = [8, 128], strides = [1, 1]} : vector<96x128xf32> to vector<8x128xf32>
    %37 = arith.maximumf %35, %36 : vector<8x128xf32>
    %38 = vector.extract_strided_slice %16 {offsets = [88, 0], sizes = [8, 128], strides = [1, 1]} : vector<96x128xf32> to vector<8x128xf32>
    %39 = arith.maximumf %37, %38 : vector<8x128xf32>
    %40 = vector.broadcast %2 : vector<1x128xf32> to vector<8x128xf32>
    %41 = arith.addf %39, %40 : vector<8x128xf32>
    %cst_5 = arith.constant 0.000000e+00 : f32
    %42 = vector.broadcast %cst_5 : f32 to vector<8x128xf32>
    %43 = arith.maximumf %41, %42 : vector<8x128xf32>
    %c0_6 = arith.constant 0 : index
    %c0_7 = arith.constant 0 : index
    %44 = vector.load %arg5[%c0_6, %c0_7] : memref<8x128xf32, #tpu.memory_space<vmem>>, vector<8x128xf32>
    tpu.vector_store %arg5[%c0_6, %c0_7], %43 {strides = array<i32>} : memref<8x128xf32, #tpu.memory_space<vmem>>, vector<8x128xf32>,
    return
  }
  func.func @transform_0(%arg0: i32, %arg1: i32) -> (i32, i32) {
    %c0_i32 = arith.constant 0 : i32
    %c0_i32_0 = arith.constant 0 : i32
    return %arg0, %c0_i32 : i32, i32
  }
  func.func @transform_1(%arg0: i32, %arg1: i32) -> (i32, i32) {
    %c0_i32 = arith.constant 0 : i32
    %c0_i32_0 = arith.constant 0 : i32
    return %c0_i32, %arg1 : i32, i32
  }
  func.func @transform_2(%arg0: i32, %arg1: i32) -> (i32, i32) {
    %c0_i32 = arith.constant 0 : i32
    %c0_i32_0 = arith.constant 0 : i32
    return %c0_i32, %arg1 : i32, i32
  }
  func.func @transform_3(%arg0: i32, %arg1: i32) -> (i32, i32) {
    %c0_i32 = arith.constant 0 : i32
    return %arg0, %arg1 : i32, i32
  }
}

</mosaic_0001>

<bundles_post_ra>
// kernel: tpu_custom_call.1
= control target key start
LH: loop header
LB: loop body
LE: loop exit
PB: predicated region body
PF: predicated region fallthrough
CT: control target
= control target key end

     0   :  { %8 = vsyncpa [#allocation3], 0  ;;  %s371_s0 = inlined_call_operand.hbm [shape: f32[8,64], index: 0, kind: input, shape index: {}]   ;;  %s372_s1 = inlined_call_operand.hbm [shape: f32[20,128], index: 1, kind: input, shape index: {}]   ;;  %s373_s2 = inlined_call_operand.vmem [shape: f32[1,128], index: 2, kind: input, shape index: {}]   ;;  %s374_s3 = inlined_call_operand.hbm [shape: f32[8,128], index: 3, kind: output, shape index: {}]  }
   0x1   :  { %9 = vsyncpa [#allocation6], 0 }
   0x2   :  { %10 = vsyncpa [#allocation4], 0  ;;  %s16_s14 = sshll.u32 %s371_s0, 4  ;;  %s307_s15 = smov [#allocation2]   ;;  %s17_s14 = int_to_ptr.hbm [resolvable:$true] %s16_s14 }
   0x3   :  { %s18_s16 = sshll.u32 %s307_s15, 4  ;;  %s26_s19 = sshll.u32 %s372_s1, 4  ;;  %s19_s16 = int_to_ptr.vmem [resolvable:$true] %s18_s16  ;;  %s27_s19 = int_to_ptr.hbm [resolvable:$true] %s26_s19 }
   0x4   :  { %21 = dma.hbm_to_vmem [thread:$0]  %s17_s14, 128, %s19_s16, [#allocation3]  }
   0x5   :  { %s308_s20 = smov [#allocation5]   ;;  %s309_s22 = smov 128  }
   0x6   :  { %s28_s21 = sshll.u32 %s308_s20, 4  ;;  %s310_s23 = smov 8   ;;  %s29_s21 = int_to_ptr.vmem [resolvable:$true] %s28_s21 }
   0x7   :  { %34 = dma.hbm_to_vmem [thread:$0]  %s27_s19, 384, %s29_s21, [#allocation6], %s309_s22, %s309_s22, %s310_s23  }
   0x8   :  { %301 = dma.done.wait [#allocation3], 128  }
   0x9   :  { %302 = vsyncadd [#allocation3], 4294967168 }
   0xa   :  { %303 = dma.done.wait [#allocation6], 384  }
   0xb   :  { %304 = vsyncadd [#allocation6], 4294966912  ;;  %vm98_vm0 = vcmask 1043456   ;;  %v45_v0 = vld [vmem:[#allocation2] sm:$0xff]  ;;  %v48_v1 = vld [vmem:[#allocation5 + $0x10] sm:$0xf] }
   0xc   :  { %s311_s0 = smov 116   ;;  %s312_s24 = smov 124   ;;  %v47_v2 = vld [vmem:[#allocation5 + $0x8] sm:$0xff]  ;;  %190 = vmatpush.msk.msra.mxu0 %vm98_vm0, %v48_v1  ;;  %v46_v3 = vld [vmem:[#allocation5] sm:$0xff]  ;;  %203 = vmatpush.msk.msra.mxu1 %vm98_vm0, %v48_v1  ;;  %vm73_vm1 = vcmask 162816  }
   0xd   :  { %55 = vrot.lane.b32.xlu0 %v45_v0, %s311_s0  ;;  %51 = vrot.lane.b32.xlu1 %v45_v0, %s312_s24  ;;  %s313_s1 = smov 112   ;;  %s314_s25 = smov 104   ;;  %v228_v37 = vld [vmem:[%s373_s2] ss:$0 sm:$0xff] }
   0xe   :  { %57 = vrot.lane.b32.xlu2 %v45_v0, %s313_s1  ;;  %204 = vmatpush.msk.msra.mxu2 %vm98_vm0, %v48_v1  ;;  %s315_s26 = smov 92   ;;  %s316_s27 = smov 100  }
   0xf   :  { %116 = vmatpush.msra.mxu0 %v47_v2  ;;  %205 = vmatpush.msk.msra.mxu3 %vm98_vm0, %v48_v1  ;;  %s317_s28 = smov 120   ;;  %s318_s29 = smov 88  }
  0x10   :  { %206 = vmatpush.msra.mxu1 %v47_v2  ;;  %207 = vmatpush.msra.mxu2 %v47_v2  ;;  %s319_s30 = smov 108   ;;  %s320_s4 = smov 96  }
  0x11   :  { %117 = vmatpush.msra.mxu0 %v46_v3  ;;  %208 = vmatpush.msra.mxu3 %v47_v2  ;;  %s321_s5 = smov 84   ;;  %s322_s8 = smov [#allocation7]  }
  0x12   :  { %191 = vmatmul.msk.f32.vlgmr.msra.gmra.mxu0 %vm73_vm1, %v45_v0  ;;  %209 = vmatpush.msra.mxu1 %v46_v3  ;;  %s177_s9 = sshll.u32 %s322_s8, 4  ;;  %s179_s12 = sshll.u32 %s374_s3, 4  ;;  %s178_s9 = int_to_ptr.vmem [resolvable:$true] %s177_s9  ;;  %s180_s12 = int_to_ptr.hbm [resolvable:$true] %s179_s12 }
  0x13   :  { %210 = vmatpush.msra.mxu2 %v46_v3  ;;  %211 = vmatpush.msra.mxu3 %v46_v3 }
  0x15   :  { %61 = vrot.lane.b32.xlu0 %v45_v0, %s314_s25  ;;  %67 = vrot.lane.b32.xlu1 %v45_v0, %s315_s26 }
  0x16   :  { %63 = vrot.lane.b32.xlu2 %v45_v0, %s316_s27 }
  0x1d   :  { %53 = vrot.lane.b32.xlu0 %v45_v0, %s317_s28  ;;  %69 = vrot.lane.b32.xlu1 %v45_v0, %s318_s29 }
  0x1e   :  { %59 = vrot.lane.b32.xlu2 %v45_v0, %s319_s30 }
  0x25   :  { %65 = vrot.lane.b32.xlu0 %v45_v0, %s320_s4  ;;  %71 = vrot.lane.b32.xlu1 %v45_v0, %s321_s5 }
  0x68   :  { %v58_v4 = vpop.permute.xlu2 %57 }
  0x70   :  { %v64_v7 = vpop.permute.xlu2 %63 }
  0x78   :  { %v60_v10 = vpop.permute.xlu2 %59 }
  0x7f   :  { %v56_v5 = vpop.permute.xlu0 %55  ;;  %v52_v6 = vpop.permute.xlu1 %51 }
  0x80   :  { %194 = vmatmul.msk.f32.vlgmr.msra.gmra.mxu1 %vm73_vm1, %v56_v5  ;;  %192 = vmatmul.msk.f32.gmra.mxu0 %vm73_vm1, %v52_v6 }
  0x87   :  { %v62_v8 = vpop.permute.xlu0 %61  ;;  %v68_v9 = vpop.permute.xlu1 %67 }
  0x88   :  { %195 = vmatmul.msk.f32.gmra.mxu1 %vm73_vm1, %v58_v4  ;;  %197 = vmatmul.msk.f32.vlgmr.msra.gmra.mxu2 %vm73_vm1, %v62_v8 }
  0x89   :  { %200 = vmatmul.msk.f32.vlgmr.msra.gmra.mxu3 %vm73_vm1, %v68_v9 }
  0x8f   :  { %v54_v11 = vpop.permute.xlu0 %53  ;;  %v70_v12 = vpop.permute.xlu1 %69 }
  0x90   :  { %193 = vmatmul.msk.f32.gmra.mxu0 %vm73_vm1, %v54_v11  ;;  %198 = vmatmul.msk.f32.gmra.mxu2 %vm73_vm1, %v64_v7  ;;  %v119_v15 = vpop.f32.mrf.mxu0 }
  0x91   :  { %196 = vmatmul.msk.f32.gmra.mxu1 %vm73_vm1, %v60_v10  ;;  %201 = vmatmul.msk.f32.gmra.mxu3 %vm73_vm1, %v70_v12 }
  0x97   :  { %v66_v13 = vpop.permute.xlu0 %65  ;;  %v72_v14 = vpop.permute.xlu1 %71 }
  0x98   :  { %199 = vmatmul.msk.f32.gmra.mxu2 %vm73_vm1, %v66_v13 }
  0x99   :  { %202 = vmatmul.msk.f32.gmra.mxu3 %vm73_vm1, %v72_v14 }
  0xfd   :  { %v128_v16 = vpop.f32.mrf.mxu1  ;;  %v122_v17 = vpop.f32.mrf.mxu0 }
  0xfe   :  { %v155_v20 = vmax.f32 %v119_v15, %v122_v17 }
 0x105   :  { %v131_v18 = vpop.f32.mrf.mxu1 }
 0x10b   :  { %v137_v19 = vpop.f32.mrf.mxu2 }
 0x10c   :  { %v146_v21 = vpop.f32.mrf.mxu3 }
 0x10d   :  { %v125_v22 = vpop.f32.mrf.mxu0 }
 0x10e   :  { %v156_v23 = vmax.f32 %v155_v20, %v125_v22  ;;  %v134_v25 = vpop.f32.mrf.mxu1 }
 0x110   :  { %v157_v24 = vmax.f32 %v156_v23, %v128_v16 }
 0x112   :  { %v158_v26 = vmax.f32 %v157_v24, %v131_v18 }
 0x113   :  { %v140_v27 = vpop.f32.mrf.mxu2 }
 0x114   :  { %v159_v28 = vmax.f32 %v158_v26, %v134_v25  ;;  %v149_v29 = vpop.f32.mrf.mxu3 }
 0x116   :  { %v160_v30 = vmax.f32 %v159_v28, %v137_v19 }
 0x118   :  { %v161_v31 = vmax.f32 %v160_v30, %v140_v27 }
 0x11b   :  { %v143_v32 = vpop.f32.mrf.mxu2 }
 0x11c   :  { %v162_v33 = vmax.f32 %v161_v31, %v143_v32  ;;  %v152_v35 = vpop.f32.mrf.mxu3 }
 0x11e   :  { %v163_v34 = vmax.f32 %v162_v33, %v146_v21 }
 0x120   :  { %v164_v36 = vmax.f32 %v163_v34, %v149_v29 }
 0x122   :  { %v165_v38 = vmax.f32 %v164_v36, %v152_v35 }
 0x124   :  { %v169_v39 = vadd.f32 %v228_v37, %v165_v38 }
 0x126   :  { %v170_v40 = vmax.f32 %v169_v39, 0.0 }
 0x128   :  { %171 = vst [vmem:[#allocation7] sm:$0xff] %v170_v40 }
 0x129   :  { %182 = dma.vmem_to_hbm [thread:$0]  %s178_s9, 128, %s180_s12, [#allocation4]  }
 0x12a   :  { %305 = dma.done.wait [#allocation4], 128  }
 0x12b   :  { %306 = vsyncadd [#allocation4], 4294967168 }
 0x12c   :  { %187 = vsyncpa [#allocation3], 1 }
 0x12d   :  { %188 = vsyncpa [#allocation6], 1 }
 0x12e   :  { %189 = vsyncpa [#allocation4], 1 }

</bundles_post_ra>
